<compile_context>
chip_gen: v7x
topology: tpu7x:2x2x1
jax: 0.10.0
libtpu: 0.0.40
codegen_flags: <defaults>
</compile_context>

<pallas_src>
import jax
import jax.numpy as jnp
from jax import lax
from jax.experimental import pallas as pl
from jax.experimental.pallas import tpu as pltpu


def _round_up(x, m):
    return (x + m - 1) // m * m


def _pad_bytes(r, c, itemsize):
    """VMEM footprint of an (r, c) buffer padded to (8, 128) layout granularity."""
    return _round_up(max(r, 1), 8) * _round_up(max(c, 1), 128) * itemsize


def _vmem_budget_and_tnmax():
    """Generation-aware scoped-VMEM budget and max vocab-tile width."""
    try:
        cap = int(pltpu.get_tpu_info().vmem_capacity_bytes)
    except Exception:  # info query unavailable -> assume smallest (v7x per-TC) VMEM
        cap = 64 * 2**20
    if cap >= 100 * 2**20:          # v5e / v6e: 128 MiB VMEM
        return 96 * 2**20, 2048
    return 48 * 2**20, 1024         # v7x: 64 MiB per TC, leave Mosaic headroom


def _vae_decoder_kernel(z_ref, w1_ref, b1_ref, w2_ref, out_ref, hid_ref):
    # z_ref:   (B, latent)        resident (constant index_map, one DMA per core)
    # w1_ref:  (hidden, latent)   resident; PyTorch layout, contracted on latent
    # b1_ref:  (1, hidden)        resident
    # w2_ref:  (tn, hidden)       streamed vocab tile; PyTorch layout
    # out_ref: (B, tn)            lane-dense logits tile (f32)
    # hid_ref: (B, hidden)        VMEM scratch in w2's dtype, persists across steps
    #
    # The hoist below is only safe because the *inner* grid axis is "arbitrary"
    # (sequential per core) and hid_ref is per-core scratch: every core runs its
    # inner loop from j == 0 before consuming any vocab tile.
    @pl.when(pl.program_id(1) == 0)
    def _():
        h = lax.dot_general(
            z_ref[...].astype(w1_ref.dtype), w1_ref[...],
            dimension_numbers=(((1,), (1,)), ((), ())),   # contract latent vs latent
            preferred_element_type=jnp.float32)
        hid_ref[...] = (h + b1_ref[...].astype(jnp.float32)).astype(hid_ref.dtype)

    # lm_head tile: (B, hidden) x (tn, hidden), contracting hidden -> (B, tn).
    # Transposed-RHS contraction is MXU-native; f32 accumulation.
    logits = lax.dot_general(
        hid_ref[...], w2_ref[...],
        dimension_numbers=(((1,), (1,)), ((), ())),
        preferred_element_type=jnp.float32)
    out_ref[...] = logits.astype(out_ref.dtype)


def vae_decoder_forward(z, w1, b1, w2):
    """z: (B, latent). w1: (hidden, latent), b1: (hidden,), w2: (vocab, hidden).

    Weights are consumed as-is (store w2 in bf16 to halve the dominant HBM
    stream; accumulation stays f32).  Returns float32 logits of shape
    (B, 1, vocab), matching VAEDecoder.forward.
    """
    B, latent = z.shape
    hidden, latent_w = w1.shape
    assert latent_w == latent
    vocab, hidden_w = w2.shape
    assert hidden_w == hidden

    budget, tn_max = _vmem_budget_and_tnmax()

    # --- vocab tile selection -------------------------------------------------
    # Largest tile (capped at tn_max) that still yields >= 2 tiles so both v7x
    # TensorCores get work; clamp down while the conservative VMEM footprint
    # (2 buffers per input / output) would exceed the budget.
    tn = min(tn_max, max(128, _round_up(-(-vocab // 2), 128)))

    def _footprint(t):
        return (2 * _pad_bytes(t, hidden, w2.dtype.itemsize)        # streamed w2 tiles
                + 2 * _pad_bytes(B, t, 4)                            # out tiles
                + 2 * (_pad_bytes(B, latent, z.dtype.itemsize)       # resident inputs
                       + _pad_bytes(hidden, latent, w1.dtype.itemsize)
                       + _pad_bytes(1, hidden, b1.dtype.itemsize))
                + _pad_bytes(B, hidden, w2.dtype.itemsize))          # hidden scratch

    while tn > 128 and _footprint(tn) > budget - 8 * 2**20:
        tn = max(128, _round_up(tn // 2, 128))

    n_split = 2                                     # one vocab chunk per v7x TensorCore
    padded_vocab = _round_up(vocab, n_split * tn)
    inner = padded_vocab // (n_split * tn)

    # Zero-pad the lm_head weight along vocab so every tile is full-width; the pad
    # columns produce logits that are sliced off below.
    # TODO(synk): do this pad (and any bf16/int8/fp8 weight prep) once at
    # weight-preparation time in production, not per forward call.
    w2p = w2 if padded_vocab == vocab else jnp.pad(w2, ((0, padded_vocab - vocab), (0, 0)))
    b1r = b1.reshape(1, hidden)

    need = _footprint(tn)
    vmem_limit = int(min(budget, max(need + 8 * 2**20, 16 * 2**20)))

    flops = 2 * B * latent * hidden + 2 * B * hidden * padded_vocab
    bytes_accessed = (z.size * z.dtype.itemsize
                      + w1.size * w1.dtype.itemsize
                      + b1.size * b1.dtype.itemsize
                      + padded_vocab * hidden * w2.dtype.itemsize
                      + B * padded_vocab * 4)

    dims_sem = ("parallel", "arbitrary")
    # The in-kernel hidden-GEMM hoist requires the inner axis to stay sequential.
    assert dims_sem[1] == "arbitrary"

    def build(single_buffer_resident):
        resident_kwargs = (
            {"pipeline_mode": pl.Buffered(1)} if single_buffer_resident else {})
        return pl.pallas_call(
            _vae_decoder_kernel,
            out_shape=jax.ShapeDtypeStruct((B, padded_vocab), jnp.float32),
            grid_spec=pltpu.PrefetchScalarGridSpec(
                num_scalar_prefetch=0,
                grid=(n_split, inner),
                in_specs=[
                    pl.BlockSpec((B, latent), lambda i, j: (0, 0), **resident_kwargs),
                    pl.BlockSpec((hidden, latent), lambda i, j: (0, 0), **resident_kwargs),
                    pl.BlockSpec((1, hidden), lambda i, j: (0, 0), **resident_kwargs),
                    pl.BlockSpec((tn, hidden), lambda i, j: (i * inner + j, 0)),
                ],
                out_specs=pl.BlockSpec((B, tn), lambda i, j: (0, i * inner + j)),
                scratch_shapes=[pltpu.VMEM((B, hidden), w2.dtype)],
            ),
            compiler_params=pltpu.CompilerParams(
                dimension_semantics=dims_sem,
                vmem_limit_bytes=vmem_limit),
            cost_estimate=pl.CostEstimate(
                flops=flops, transcendentals=0, bytes_accessed=bytes_accessed),
        )

    try:
        logits2d = build(True)(z, w1, b1r, w2p)
    except Exception:
        # Fallback for Pallas versions that reject single-buffer pipeline_mode:
        # default double-buffered resident inputs are correct, just use more VMEM.
        logits2d = build(False)(z, w1, b1r, w2p)

    if padded_vocab != vocab:
        logits2d = logits2d[:, :vocab]
    return logits2d.reshape(B, 1, vocab)


if __name__ == "__main__":
    # Small, deterministic synthetic configuration (no checkpoint load).
    B = 2            # batch
    LATENT = 64      # latent_dim
    HIDDEN = 32      # base_model.config.hidden_size
    VOCAB = 256      # lm_head output size (multiple of the tile width)
    VOCAB_ODD = 200  # exercises the padded / sliced vocab path

    key = jax.random.PRNGKey(0)
    k_z, k_w1, k_b1, k_w2, k_w2b = jax.random.split(key, 5)

    z = jax.random.normal(k_z, (B, LATENT), dtype=jnp.float32)
    # nn.Linear(latent_dim, hidden_size): weight (hidden, latent), bias (hidden,)
    w1 = jax.random.normal(k_w1, (HIDDEN, LATENT), dtype=jnp.float32) * 0.02
    b1 = jax.random.normal(k_b1, (HIDDEN,), dtype=jnp.float32) * 0.02
    # lm_head: Linear(hidden_size, vocab_size, bias=False): weight (vocab, hidden).
    w2 = jax.random.normal(k_w2, (VOCAB, HIDDEN), dtype=jnp.float32) * 0.02
    w2_odd = jax.random.normal(k_w2b, (VOCAB_ODD, HIDDEN), dtype=jnp.float32) * 0.02

    # Reference forward (same math as the PyTorch module).
    hidden_ref = z @ w1.T + b1

    # 1) divisible vocab
    logits = jax.block_until_ready(vae_decoder_forward(z, w1, b1, w2))
    logits_ref = hidden_ref[:, None, :] @ w2.T
    assert logits.shape == (B, 1, VOCAB), logits.shape
    assert jnp.allclose(logits, logits_ref, atol=2e-3, rtol=2e-2), (
        float(jnp.max(jnp.abs(logits - logits_ref))))

    # 2) non-divisible vocab (padded tiles + output slice)
    logits_odd = jax.block_until_ready(vae_decoder_forward(z, w1, b1, w2_odd))
    logits_odd_ref = hidden_ref[:, None, :] @ w2_odd.T
    assert logits_odd.shape == (B, 1, VOCAB_ODD), logits_odd.shape
    assert jnp.allclose(logits_odd, logits_odd_ref, atol=2e-3, rtol=2e-2), (
        float(jnp.max(jnp.abs(logits_odd - logits_odd_ref))))

    print("KERNEL_OK")
</pallas_src>

<mosaic_0001>
module attributes {stable_mosaic.version = 11 : i64} {
  func.func @_vae_decoder_kernel(%arg0: i32, %arg1: i32, %arg2: memref<2x64xf32, #tpu.memory_space<vmem>>, %arg3: memref<32x64xf32, #tpu.memory_space<vmem>>, %arg4: memref<1x32xf32, #tpu.memory_space<vmem>>, %arg5: memref<128x32xf32, #tpu.memory_space<vmem>>, %arg6: memref<2x128xf32, #tpu.memory_space<vmem>>, %arg7: memref<2x32xf32, #tpu.memory_space<vmem>>) attributes {dimension_semantics = [#tpu.dimension_semantics<parallel>, #tpu.dimension_semantics<arbitrary>], iteration_bounds = array<i64: 2, 1>, scalar_prefetch = 0 : i64, scratch_operands = 1 : i64, tpu.core_type = #tpu.core_type<tc>, window_params = [{pipeline_mode = #tpu.pipeline_mode<synchronous>, transform_indices = @transform_0, window_bounds = array<i64: 2, 64>}, {pipeline_mode = #tpu.pipeline_mode<synchronous>, transform_indices = @transform_1, window_bounds = array<i64: 32, 64>}, {pipeline_mode = #tpu.pipeline_mode<synchronous>, transform_indices = @transform_2, window_bounds = array<i64: 1, 32>}, {transform_indices = @transform_3, window_bounds = array<i64: 128, 32>}, {transform_indices = @transform_4, window_bounds = array<i64: 2, 128>}]} {
    %c0_i32 = arith.constant 0 : i32
    %0 = arith.cmpi eq, %arg1, %c0_i32 : i32
    %1 = arith.extui %0 : i1 to i32
    %c0_i32_0 = arith.constant 0 : i32
    %2 = arith.cmpi ne, %1, %c0_i32_0 : i32
    scf.if %2 {
      %c0_6 = arith.constant 0 : index
      %c0_7 = arith.constant 0 : index
      %7 = vector.load %arg2[%c0_6, %c0_7] : memref<2x64xf32, #tpu.memory_space<vmem>>, vector<2x64xf32>
      %c0_8 = arith.constant 0 : index
      %c0_9 = arith.constant 0 : index
      %8 = vector.load %arg3[%c0_8, %c0_9] : memref<32x64xf32, #tpu.memory_space<vmem>>, vector<32x64xf32>
      %cst_10 = arith.constant dense<0.000000e+00> : vector<2x32xf32>
      %9 = tpu.matmul %7, %8, %cst_10 {dimension_numbers = #tpu.dot_dimension_numbers<[1], [1], [0], [0], [0, 0, 1, 0], [], []>} : vector<2x64xf32>, vector<32x64xf32>, vector<2x32xf32> -> vector<2x32xf32>
      %c0_11 = arith.constant 0 : index
      %c0_12 = arith.constant 0 : index
      %10 = vector.load %arg4[%c0_11, %c0_12] : memref<1x32xf32, #tpu.memory_space<vmem>>, vector<1x32xf32>
      %11 = vector.broadcast %10 : vector<1x32xf32> to vector<2x32xf32>
      %12 = arith.addf %9, %11 : vector<2x32xf32>
      %c0_13 = arith.constant 0 : index
      %c0_14 = arith.constant 0 : index
      %13 = vector.load %arg7[%c0_13, %c0_14] : memref<2x32xf32, #tpu.memory_space<vmem>>, vector<2x32xf32>
      tpu.vector_store %arg7[%c0_13, %c0_14], %12 {strides = array<i32>} : memref<2x32xf32, #tpu.memory_space<vmem>>, vector<2x32xf32>,
    } else {
    }
    %c0 = arith.constant 0 : index
    %c0_1 = arith.constant 0 : index
    %3 = vector.load %arg7[%c0, %c0_1] : memref<2x32xf32, #tpu.memory_space<vmem>>, vector<2x32xf32>
    %c0_2 = arith.constant 0 : index
    %c0_3 = arith.constant 0 : index
    %4 = vector.load %arg5[%c0_2, %c0_3] : memref<128x32xf32, #tpu.memory_space<vmem>>, vector<128x32xf32>
    %cst = arith.constant dense<0.000000e+00> : vector<2x128xf32>
    %5 = tpu.matmul %3, %4, %cst {dimension_numbers = #tpu.dot_dimension_numbers<[1], [1], [0], [0], [0, 0, 1, 0], [], []>} : vector<2x32xf32>, vector<128x32xf32>, vector<2x128xf32> -> vector<2x128xf32>
    %c0_4 = arith.constant 0 : index
    %c0_5 = arith.constant 0 : index
    %6 = vector.load %arg6[%c0_4, %c0_5] : memref<2x128xf32, #tpu.memory_space<vmem>>, vector<2x128xf32>
    tpu.vector_store %arg6[%c0_4, %c0_5], %5 {strides = array<i32>} : memref<2x128xf32, #tpu.memory_space<vmem>>, vector<2x128xf32>,
    return
  }
  func.func @transform_0(%arg0: i32, %arg1: i32) -> (i32, i32) {
    %c0_i32 = arith.constant 0 : i32
    %c0_i32_0 = arith.constant 0 : i32
    %c0_i32_1 = arith.constant 0 : i32
    return %c0_i32, %c0_i32_0 : i32, i32
  }
  func.func @transform_1(%arg0: i32, %arg1: i32) -> (i32, i32) {
    %c0_i32 = arith.constant 0 : i32
    %c0_i32_0 = arith.constant 0 : i32
    %c0_i32_1 = arith.constant 0 : i32
    return %c0_i32, %c0_i32_0 : i32, i32
  }
  func.func @transform_2(%arg0: i32, %arg1: i32) -> (i32, i32) {
    %c0_i32 = arith.constant 0 : i32
    %c0_i32_0 = arith.constant 0 : i32
    %c0_i32_1 = arith.constant 0 : i32
    return %c0_i32, %c0_i32_0 : i32, i32
  }
  func.func @transform_3(%arg0: i32, %arg1: i32) -> (i32, i32) {
    %c1_i32 = arith.constant 1 : i32
    %0 = arith.muli %arg0, %c1_i32 : i32
    %1 = arith.addi %0, %arg1 : i32
    %c0_i32 = arith.constant 0 : i32
    %c0_i32_0 = arith.constant 0 : i32
    return %1, %c0_i32 : i32, i32
  }
  func.func @transform_4(%arg0: i32, %arg1: i32) -> (i32, i32) {
    %c1_i32 = arith.constant 1 : i32
    %0 = arith.muli %arg0, %c1_i32 : i32
    %1 = arith.addi %0, %arg1 : i32
    %c0_i32 = arith.constant 0 : i32
    %c0_i32_0 = arith.constant 0 : i32
    return %c0_i32, %1 : i32, i32
  }
}

module attributes {stable_mosaic.version = 11 : i64} {
  func.func @_vae_decoder_kernel(%arg0: i32, %arg1: i32, %arg2: memref<2x64xf32, #tpu.memory_space<vmem>>, %arg3: memref<32x64xf32, #tpu.memory_space<vmem>>, %arg4: memref<1x32xf32, #tpu.memory_space<vmem>>, %arg5: memref<128x32xf32, #tpu.memory_space<vmem>>, %arg6: memref<2x128xf32, #tpu.memory_space<vmem>>, %arg7: memref<2x32xf32, #tpu.memory_space<vmem>>) attributes {dimension_semantics = [#tpu.dimension_semantics<parallel>, #tpu.dimension_semantics<arbitrary>], iteration_bounds = array<i64: 2, 1>, scalar_prefetch = 0 : i64, scratch_operands = 1 : i64, tpu.core_type = #tpu.core_type<tc>, window_params = [{pipeline_mode = #tpu.pipeline_mode<synchronous>, transform_indices = @transform_0, window_bounds = array<i64: 2, 64>}, {pipeline_mode = #tpu.pipeline_mode<synchronous>, transform_indices = @transform_1, window_bounds = array<i64: 32, 64>}, {pipeline_mode = #tpu.pipeline_mode<synchronous>, transform_indices = @transform_2, window_bounds = array<i64: 1, 32>}, {transform_indices = @transform_3, window_bounds = array<i64: 128, 32>}, {transform_indices = @transform_4, window_bounds = array<i64: 2, 128>}]} {
    %c0_i32 = arith.constant 0 : i32
    %0 = arith.cmpi eq, %arg1, %c0_i32 : i32
    %1 = arith.extui %0 : i1 to i32
    %c0_i32_0 = arith.constant 0 : i32
    %2 = arith.cmpi ne, %1, %c0_i32_0 : i32
    scf.if %2 {
      %c0_6 = arith.constant 0 : index
      %c0_7 = arith.constant 0 : index
      %7 = vector.load %arg2[%c0_6, %c0_7] : memref<2x64xf32, #tpu.memory_space<vmem>>, vector<2x64xf32>
      %c0_8 = arith.constant 0 : index
      %c0_9 = arith.constant 0 : index
      %8 = vector.load %arg3[%c0_8, %c0_9] : memref<32x64xf32, #tpu.memory_space<vmem>>, vector<32x64xf32>
      %cst_10 = arith.constant dense<0.000000e+00> : vector<2x32xf32>
      %9 = tpu.matmul %7, %8, %cst_10 {dimension_numbers = #tpu.dot_dimension_numbers<[1], [1], [0], [0], [0, 0, 1, 0], [], []>} : vector<2x64xf32>, vector<32x64xf32>, vector<2x32xf32> -> vector<2x32xf32>
      %c0_11 = arith.constant 0 : index
      %c0_12 = arith.constant 0 : index
      %10 = vector.load %arg4[%c0_11, %c0_12] : memref<1x32xf32, #tpu.memory_space<vmem>>, vector<1x32xf32>
      %11 = vector.broadcast %10 : vector<1x32xf32> to vector<2x32xf32>
      %12 = arith.addf %9, %11 : vector<2x32xf32>
      %c0_13 = arith.constant 0 : index
      %c0_14 = arith.constant 0 : index
      %13 = vector.load %arg7[%c0_13, %c0_14] : memref<2x32xf32, #tpu.memory_space<vmem>>, vector<2x32xf32>
      tpu.vector_store %arg7[%c0_13, %c0_14], %12 {strides = array<i32>} : memref<2x32xf32, #tpu.memory_space<vmem>>, vector<2x32xf32>,
    } else {
    }
    %c0 = arith.constant 0 : index
    %c0_1 = arith.constant 0 : index
    %3 = vector.load %arg7[%c0, %c0_1] : memref<2x32xf32, #tpu.memory_space<vmem>>, vector<2x32xf32>
    %c0_2 = arith.constant 0 : index
    %c0_3 = arith.constant 0 : index
    %4 = vector.load %arg5[%c0_2, %c0_3] : memref<128x32xf32, #tpu.memory_space<vmem>>, vector<128x32xf32>
    %cst = arith.constant dense<0.000000e+00> : vector<2x128xf32>
    %5 = tpu.matmul %3, %4, %cst {dimension_numbers = #tpu.dot_dimension_numbers<[1], [1], [0], [0], [0, 0, 1, 0], [], []>} : vector<2x32xf32>, vector<128x32xf32>, vector<2x128xf32> -> vector<2x128xf32>
    %c0_4 = arith.constant 0 : index
    %c0_5 = arith.constant 0 : index
    %6 = vector.load %arg6[%c0_4, %c0_5] : memref<2x128xf32, #tpu.memory_space<vmem>>, vector<2x128xf32>
    tpu.vector_store %arg6[%c0_4, %c0_5], %5 {strides = array<i32>} : memref<2x128xf32, #tpu.memory_space<vmem>>, vector<2x128xf32>,
    return
  }
  func.func @transform_0(%arg0: i32, %arg1: i32) -> (i32, i32) {
    %c0_i32 = arith.constant 0 : i32
    %c0_i32_0 = arith.constant 0 : i32
    %c0_i32_1 = arith.constant 0 : i32
    return %c0_i32, %c0_i32_0 : i32, i32
  }
  func.func @transform_1(%arg0: i32, %arg1: i32) -> (i32, i32) {
    %c0_i32 = arith.constant 0 : i32
    %c0_i32_0 = arith.constant 0 : i32
    %c0_i32_1 = arith.constant 0 : i32
    return %c0_i32, %c0_i32_0 : i32, i32
  }
  func.func @transform_2(%arg0: i32, %arg1: i32) -> (i32, i32) {
    %c0_i32 = arith.constant 0 : i32
    %c0_i32_0 = arith.constant 0 : i32
    %c0_i32_1 = arith.constant 0 : i32
    return %c0_i32, %c0_i32_0 : i32, i32
  }
  func.func @transform_3(%arg0: i32, %arg1: i32) -> (i32, i32) {
    %c1_i32 = arith.constant 1 : i32
    %0 = arith.muli %arg0, %c1_i32 : i32
    %1 = arith.addi %0, %arg1 : i32
    %c0_i32 = arith.constant 0 : i32
    %c0_i32_0 = arith.constant 0 : i32
    return %1, %c0_i32 : i32, i32
  }
  func.func @transform_4(%arg0: i32, %arg1: i32) -> (i32, i32) {
    %c1_i32 = arith.constant 1 : i32
    %0 = arith.muli %arg0, %c1_i32 : i32
    %1 = arith.addi %0, %arg1 : i32
    %c0_i32 = arith.constant 0 : i32
    %c0_i32_0 = arith.constant 0 : i32
    return %c0_i32, %1 : i32, i32
  }
}

</mosaic_0001>

<bundles_post_ra>
// kernel: tpu_custom_call.1
= control target key start
LH: loop header
LB: loop body
LE: loop exit
PB: predicated region body
PF: predicated region fallthrough
CT: control target
= control target key end

     0   :  { %9 = vsyncpa [#allocation4], 0  ;;  %s1038_s0 = inlined_call_operand.vmem [shape: f32[2,64], index: 0, kind: input, shape index: {}]   ;;  %s1039_s1 = inlined_call_operand.vmem [shape: f32[32,64], index: 1, kind: input, shape index: {}]   ;;  %s1040_s2 = inlined_call_operand.vmem [shape: f32[1,32], index: 2, kind: input, shape index: {}]   ;;  %s1041_s3 = inlined_call_operand.vmem [shape: f32[256,32], index: 3, kind: input, shape index: {}]   ;;  %s1042_s4 = inlined_call_operand.hbm [shape: f32[2,256], index: 4, kind: output, shape index: {}]  }
   0x1   :  { %11 = vsyncpa [#allocation4 + $0x1], 0  ;;  %s857_s15 = smov 0   ;;  %s859_s16 = smov 0  }
   0x2   :  { %s861_s17 = smov 0   ;;  %s863_s18 = smov 0  }
   0x3   :  { %s865_s19 = smov 0   ;;  %s867_s20 = smov 0  }
   0x4 LB: > { %s547_s21 = sadd.s32 4294967295, %s826_s20   ;;  %s548_s22 = sadd.s32 4294967294, %s826_s20   ;;  %s826_s20 = sphi %s867_s20, %s17_s20   ;;  %s822_s19 = sphi %s865_s19, %s1053_s19   ;;  %s818_s18 = sphi %s863_s18, %s1052_s18   ;;  %s814_s17 = sphi %s861_s17, %s1051_s17   ;;  %s810_s16 = sphi %s859_s16, %s1050_s16   ;;  %s806_s15 = sphi %s857_s15, %s1049_s15  }
   0x5   : > { %s29_s23 = sadd.s32 1, %s822_s19  ;;  %s129_s24 = sadd.s32 1, %s814_s17 }
   0x6   : > { %p31_p0 = scmp.ge.s32.totalorder %s29_s23, 2  ;;  %p139_p1 = scmp.ne.s32.totalorder %s814_s17, %s810_s16 }
   0x7   : > { %p140_p2 = scmp.eq.s32.totalorder %s547_s21, 1  ;;  %p145_p3 = scmp.ne.s32.totalorder %s810_s16, %s806_s15 }
   0x8   : > { %s1055_s23 = smov (%p31_p0, %s29_s23), 0  ;;  %p146_p5 = scmp.eq.s32.totalorder %s548_s22, 1 }
   0x9   : > { %p897_p4 = por %p140_p2, %p139_p1  ;;  %s126_s26 = ssub.s32 %s822_s19, %s1055_s23 }
   0xa   : > { %p551_p6 = scmp.ge.s32.totalorder %s826_s20, 1  ;;  %p127_p7 = scmp.eq.s32.totalorder %s126_s26, 0 }
   0xb   : > { %p904_p8 = por %p146_p5, %p145_p3  ;;  %p184_p9 = scmp.lt.s32.totalorder %s826_s20, 3 }
   0xc   : > { %s910_s28 = scalar_select %p127_p7, %s814_s17, %s129_s24  }
   0xd   : > { %p185_p10 = pnand %p551_p6, %p184_p9 }
   0xe   : > { %v225_v0 = vld [vmem:[%s1039_s1] sm:$0xff] (!%p185_p10)  ;;  %v226_v1 = vld [vmem:[%s1039_s1 + $0x8] sm:$0xff] (!%p185_p10)  ;;  %vm236_vm0 = vcmask (!%p185_p10), 523264   ;;  %v828_v2 = vmov (!%p185_p10), 0.0|0.0   ;;  %s553_s7 = sshll.u32 (!%p185_p10), %s818_s18, 4  ;;  %vm829_vm2 = vmmov (!%p185_p10), 0  }
   0xf   : > { %188 = sbr.rel (%p185_p10) target bundleno = 480 (0x1e0), region = 36  ;;  %650 = vmatprep.subr.bf16.mxu0 (!%p185_p10), %v828_v2  ;;  %v651_v3 = vpack.c.bf16 (!%p185_p10), %v226_v1, %v225_v0  ;;  %vm920_vm1 = vmpackc.low (!%p185_p10), %vm236_vm0, %vm236_vm0  ;;  %658 = vmatprep.subr.bf16.mxu1 (!%p185_p10), %v828_v2  ;;  %v830_v5 = vmov (!%p185_p10), 0.0   ;;  %p213_p11 = scmp.lt.s32.totalorder (!%p185_p10), %s553_s7, 31  ;;  %v227_v6 = vld [vmem:[%s1039_s1 + $0x10] sm:$0xff] (!%p185_p10)  ;;  %v228_v7 = vld [vmem:[%s1039_s1 + $0x18] sm:$0xff] (!%p185_p10)  ;;  %vm341_vm3 = vcmask (!%p185_p10), 261120  }
  0x10   : > { %612 = vmatprep.mubr.msk.f32.mxu0 (!%p185_p10), %vm829_vm2, %v830_v5  ;;  %647 = vmatprep.mubr.msk.f32.mxu1 (!%p185_p10), %vm829_vm2, %v830_v5  ;;  %v655_v8 = vpack.c.bf16 (!%p185_p10), %v228_v7, %v227_v6  ;;  %vm942_vm4 = vmpackc.low (!%p185_p10), %vm341_vm3, %vm341_vm3  ;;  %v224_v15 = vld [vmem:[%s1038_s0] sm:$0x3] (!%p185_p10)  ;;  %vm322_vm5 = vcmask (!%p185_p10), 254976   ;;  %s208_s30 = sand.u32 (!%p185_p10), 1, %s810_s16   ;;  %s579_s8 = sshll.u32 (!%p185_p10), %s818_s18, 5 }
  0x11   : > { %653 = vmatpush3.bf16.xpose.msk.msra.mxu0 (!%p185_p10), %vm920_vm1, %v651_v3  ;;  %v555_v35 = vld [vmem:[%s1040_s2] ss:$0 sm:$0xff] (!%p185_p10)  ;;  %s552_s5 = sshll.u32 (!%p185_p10), %s208_s30, 1  ;;  %s993_s11 = scalar_lea.hbm (!%p185_p10), %s1042_s4, %s579_s8 }
  0x12   : > { %654 = vmatprep.subr.bf16.mxu0 (!%p185_p10), %v828_v2  ;;  %s210_s6 = scalar_lea.vmem (!%p185_p10), [#allocation3], %s552_s5  ;;  %s831_s18 = smov (!%p185_p10), [#allocation3]  }
  0x13   : > { %s752_s14 = sshll.u32 (!%p185_p10), %s831_s18, 4  ;;  %s753_s14 = int_to_ptr.vmem [resolvable:$false] %s752_s14 }
  0x16   : > { %s1057_s7 = smov (!%p213_p11, %s553_s7), 31 }
  0x17   : > { %s554_s12 = sshll.u32 %s1057_s7, 3  ;;  %s479_s7 = sshll.u32 %s210_s6, 4  ;;  %s988_s7 = int_to_ptr.vmem [resolvable:$true] %s479_s7 }
  0x18   : > { %s936_s21 = scalar_lea.vmem %s1041_s3, %s554_s12  ;;  %s465_s12 = scalar_lea.sflag [#allocation4], %s208_s30 }
  0x19   : > { %v325_v9 = vld [vmem:[%s936_s21] sm:$0xff]  ;;  %v326_v10 = vld [vmem:[%s936_s21 + $0x8] sm:$0xff]  ;;  %657 = vmatpush3.bf16.xpose.msk.msra.mxu0 %vm920_vm1, %v655_v8  ;;  %v327_v13 = vld [vmem:[%s936_s21 + $0x10] sm:$0xff]  ;;  %s748_s13 = scalar_lea.vmem %s988_s7, 32  ;;  %p755_p1 = scmp.lt.s32.totalorder %s988_s7, %s753_s14 }
  0x1a   : > { %v659_v12 = vpack.c.bf16 %v326_v10, %v325_v9  ;;  %v328_v14 = vld [vmem:[%s936_s21 + $0x18] sm:$0xff]  ;;  %v329_v17 = vld [vmem:[%s936_s21 + $0x20] sm:$0xff]  ;;  %v330_v18 = vld [vmem:[%s936_s21 + $0x28] sm:$0xff]  ;;  %p749_p12 = scmp.ne.s32.totalorder %s988_s7, %s748_s13 }
  0x1b   : > { %v663_v16 = vpack.c.bf16 %v328_v14, %v327_v13  ;;  %v667_v19 = vpack.c.bf16 %v330_v18, %v329_v17  ;;  %v331_v20 = vld [vmem:[%s936_s21 + $0x30] sm:$0xff]  ;;  %v332_v21 = vld [vmem:[%s936_s21 + $0x38] sm:$0xff]  ;;  %v333_v23 = vld [vmem:[%s936_s21 + $0x40] sm:$0xff] }
  0x1c   : > { %661 = vmatpush3.bf16.xpose.msk.msra.mxu1 %vm942_vm4, %v659_v12  ;;  %v671_v22 = vpack.c.bf16 %v332_v21, %v331_v20  ;;  %v334_v24 = vld [vmem:[%s936_s21 + $0x48] sm:$0xff]  ;;  %v335_v26 = vld [vmem:[%s936_s21 + $0x50] sm:$0xff]  ;;  %v336_v27 = vld [vmem:[%s936_s21 + $0x58] sm:$0xff]  ;;  %p750_p13 = pnand %p749_p12, %p897_p4 }
  0x1d   : > { %662 = vmatprep.subr.bf16.mxu1 %v828_v2  ;;  %v675_v25 = vpack.c.bf16 %v334_v24, %v333_v23  ;;  %v679_v28 = vpack.c.bf16 %v336_v27, %v335_v26  ;;  %v337_v29 = vld [vmem:[%s936_s21 + $0x60] sm:$0xff]  ;;  %v338_v30 = vld [vmem:[%s936_s21 + $0x68] sm:$0xff]  ;;  %v339_v32 = vld [vmem:[%s936_s21 + $0x70] sm:$0xff] }
  0x1e   : > { %v683_v31 = vpack.c.bf16 %v338_v30, %v337_v29  ;;  %v340_v33 = vld [vmem:[%s936_s21 + $0x78] sm:$0xff]  ;;  %p751_p0 = pneg %p750_p13  ;;  %s754_s21 = scalar_lea.vmem %s753_s14, 64 }
  0x1f   : > { %v687_v34 = vpack.c.bf16 %v340_v33, %v339_v32  ;;  %p756_p2 = scmp.lt.s32.totalorder %s754_s21, %s748_s13 }
  0x20   : > { %613 = vmatmul.mubr.msk.f32.vlgmr.msra.gmra.mrb[0].mxu0 %vm236_vm0, %v224_v15 }
  0x21   : > { %p757_p3 = por %p756_p2, %p755_p1 }
  0x23   : > { %p758_p5 = pnand %p757_p3, %p751_p0 }
  0x24   : > { %665 = vmatpush3.bf16.xpose.msk.msra.mxu1 %vm942_vm4, %v663_v16 }
  0x25   : > { %666 = vmatprep.subr.bf16.mxu1 %v828_v2 }
  0x2c   : > { %669 = vmatpush3.bf16.xpose.msk.msra.mxu1 %vm942_vm4, %v667_v19 }
  0x2d   : > { %670 = vmatprep.subr.bf16.mxu1 %v828_v2 }
  0x34   : > { %673 = vmatpush3.bf16.xpose.msk.msra.mxu1 %vm942_vm4, %v671_v22 }
  0x35   : > { %674 = vmatprep.subr.bf16.mxu1 %v828_v2 }
  0x3c   : > { %677 = vmatpush3.bf16.xpose.msk.msra.mxu1 %vm942_vm4, %v675_v25 }
  0x3d   : > { %678 = vmatprep.subr.bf16.mxu1 %v828_v2 }
  0x44   : > { %681 = vmatpush3.bf16.xpose.msk.msra.mxu1 %vm942_vm4, %v679_v28 }
  0x45   : > { %682 = vmatprep.subr.bf16.mxu1 %v828_v2 }
  0x4c   : > { %685 = vmatpush3.bf16.xpose.msk.msra.mxu1 %vm942_vm4, %v683_v31 }
  0x4d   : > { %686 = vmatprep.subr.bf16.mxu1 %v828_v2 }
  0x54   : > { %689 = vmatpush3.bf16.xpose.msk.msra.mxu1 %vm942_vm4, %v687_v34 }
  0xf3   : > { %v318_v36 = vpop.f32.mrb[0].mxu0 }
  0xf4   : > { %v319_v37 = vadd.f32 %v555_v35, %v318_v36  ;;  %v614_v38 = vpop.f32.mrb[1].mxu0 }
  0xf6   : > { %323 = vst.msk [vmem:[#allocation2] sm:$0x3] %vm322_vm5, %v319_v37 }
  0xfd   : > { %v324_v39 = vld [vmem:[#allocation2] sm:$0x3] }
  0xfe   : > { %648 = vmatmul.mubr.msk.f32.vlgmr.msra.gmra.mrb[0].mxu1 %vm341_vm3, %v324_v39 }
 0x1d1   : > { %v459_v40 = vpop.f32.mrb[0].mxu1 }
 0x1d2   : > { %463 = vst [vmem:[%s210_s6] sm:$0x3] %v459_v40  ;;  %v649_v41 = vpop.f32.mrb[1].mxu1 }
 0x1d3   : > { %761 = shalt.err (!%p758_p5)
}
 0x1d4   : > { %s762_s22 = scalar_lea.hbm %s993_s11, 32  ;;  %s766_s29 = scalar_lea.hbm %s1042_s4, 64 }
 0x1d5   : > { %p763_p6 = scmp.ne.s32.totalorder %s993_s11, %s762_s22  ;;  %p767_p10 = scmp.lt.u32.totalorder %s993_s11, %s1042_s4 }
 0x1d6   : > { %p768_p11 = scmp.lt.u32.totalorder %s766_s29, %s762_s22  ;;  %p770_p13 = scmp.lt.u32.totalorder %s762_s22, %s993_s11 }
 0x1d7   : > { %p764_p7 = pnand %p763_p6, %p897_p4 }
 0x1d8   : > { %p769_p12 = por %p768_p11, %p767_p10 }
 0x1d9   : > { %p765_p9 = pneg %p764_p7 }
 0x1da   : > { %p771_p0 = por %p770_p13, %p769_p12 }
 0x1dc   : > { %p772_p1 = pnand %p771_p0, %p765_p9 }
 0x1de   : > { %775 = shalt.err (!%p772_p1)
}
 0x1df   : > { %690 = dma.vmem_to_hbm [thread:$0]  (%p897_p4), %s988_s7, 32, %s993_s11, %s465_s12  }
 0x1e0 PF: > { %p696_p2 = scmp.ge.s32.totalorder %s826_s20, 2  ;;  %s491_s6 = sand.u32 1, %s806_s15  }
 0x1e1   : > { %s492_s8 = scalar_lea.sflag [#allocation4], %s491_s6 }
 0x1e2   : > { %p693_p3 = pnand %p696_p2, %p904_p8 }
 0x1e4   : > { %801 = dma.done.wait (!%p693_p3), %s492_s8, 32  }
 0x1e5   : > { %803 = vsyncadd (!%p693_p3), %s492_s8, 4294967264  ;;  %s17_s20 = sadd.s32 1, %s826_s20   ;;  %s1049_s15 = smov %s810_s16 }
 0x1e6   : > { %p14_p5 = scmp.ge.s32.totalorder %s17_s20, 4   ;;  %s1050_s16 = smov %s814_s17 }
 0x1e7   : > { %s1051_s17 = smov %s910_s28  ;;  %s1052_s18 = smov %s822_s19 }
 0x1e8   : > { %s1053_s19 = smov %s1055_s23  ;;  %16 = sbr.rel (!%p14_p5) target bundleno = 4 (0x4), region = 75 }
 0x1ef   :  { %497 = vsyncpa [#allocation4], 1 }
 0x1f0   :  { %499 = vsyncpa [#allocation4 + $0x1], 1 }

// kernel: tpu_custom_call.1
= control target key start
LH: loop header
LB: loop body
LE: loop exit
PB: predicated region body
PF: predicated region fallthrough
CT: control target
= control target key end

     0   :  { %9 = vsyncpa [#allocation4], 0  ;;  %s1038_s0 = inlined_call_operand.vmem [shape: f32[2,64], index: 0, kind: input, shape index: {}]   ;;  %s1039_s1 = inlined_call_operand.vmem [shape: f32[32,64], index: 1, kind: input, shape index: {}]   ;;  %s1040_s2 = inlined_call_operand.vmem [shape: f32[1,32], index: 2, kind: input, shape index: {}]   ;;  %s1041_s3 = inlined_call_operand.vmem [shape: f32[256,32], index: 3, kind: input, shape index: {}]   ;;  %s1042_s4 = inlined_call_operand.hbm [shape: f32[2,256], index: 4, kind: output, shape index: {}]  }
   0x1   :  { %11 = vsyncpa [#allocation4 + $0x1], 0  ;;  %s857_s15 = smov 0   ;;  %s859_s16 = smov 0  }
   0x2   :  { %s861_s17 = smov 0   ;;  %s863_s18 = smov 0  }
   0x3   :  { %s865_s19 = smov 0   ;;  %s867_s20 = smov 0  }
   0x4 LB: > { %s547_s21 = sadd.s32 4294967295, %s826_s20   ;;  %s548_s22 = sadd.s32 4294967294, %s826_s20   ;;  %s826_s20 = sphi %s867_s20, %s17_s20   ;;  %s822_s19 = sphi %s865_s19, %s1053_s19   ;;  %s818_s18 = sphi %s863_s18, %s1052_s18   ;;  %s814_s17 = sphi %s861_s17, %s1051_s17   ;;  %s810_s16 = sphi %s859_s16, %s1050_s16   ;;  %s806_s15 = sphi %s857_s15, %s1049_s15  }
   0x5   : > { %s29_s23 = sadd.s32 1, %s822_s19  ;;  %s129_s24 = sadd.s32 1, %s814_s17 }
   0x6   : > { %p31_p0 = scmp.ge.s32.totalorder %s29_s23, 2  ;;  %p139_p1 = scmp.ne.s32.totalorder %s814_s17, %s810_s16 }
   0x7   : > { %p140_p2 = scmp.eq.s32.totalorder %s547_s21, 1  ;;  %p145_p3 = scmp.ne.s32.totalorder %s810_s16, %s806_s15 }
   0x8   : > { %s1055_s23 = smov (%p31_p0, %s29_s23), 0  ;;  %p146_p5 = scmp.eq.s32.totalorder %s548_s22, 1 }
   0x9   : > { %p897_p4 = por %p140_p2, %p139_p1  ;;  %s126_s26 = ssub.s32 %s822_s19, %s1055_s23 }
   0xa   : > { %p551_p6 = scmp.ge.s32.totalorder %s826_s20, 1  ;;  %p127_p7 = scmp.eq.s32.totalorder %s126_s26, 0 }
   0xb   : > { %p904_p8 = por %p146_p5, %p145_p3  ;;  %p184_p9 = scmp.lt.s32.totalorder %s826_s20, 3 }
   0xc   : > { %s910_s28 = scalar_select %p127_p7, %s814_s17, %s129_s24  }
   0xd   : > { %p185_p10 = pnand %p551_p6, %p184_p9 }
   0xe   : > { %v225_v0 = vld [vmem:[%s1039_s1] sm:$0xff] (!%p185_p10)  ;;  %v226_v1 = vld [vmem:[%s1039_s1 + $0x8] sm:$0xff] (!%p185_p10)  ;;  %vm236_vm0 = vcmask (!%p185_p10), 523264   ;;  %v828_v2 = vmov (!%p185_p10), 0.0|0.0   ;;  %s553_s7 = sshll.u32 (!%p185_p10), %s818_s18, 4  ;;  %vm829_vm2 = vmmov (!%p185_p10), 0  }
   0xf   : > { %188 = sbr.rel (%p185_p10) target bundleno = 480 (0x1e0), region = 36  ;;  %650 = vmatprep.subr.bf16.mxu0 (!%p185_p10), %v828_v2  ;;  %v651_v3 = vpack.c.bf16 (!%p185_p10), %v226_v1, %v225_v0  ;;  %vm920_vm1 = vmpackc.low (!%p185_p10), %vm236_vm0, %vm236_vm0  ;;  %658 = vmatprep.subr.bf16.mxu1 (!%p185_p10), %v828_v2  ;;  %v830_v5 = vmov (!%p185_p10), 0.0   ;;  %p213_p11 = scmp.lt.s32.totalorder (!%p185_p10), %s553_s7, 31  ;;  %v227_v6 = vld [vmem:[%s1039_s1 + $0x10] sm:$0xff] (!%p185_p10)  ;;  %v228_v7 = vld [vmem:[%s1039_s1 + $0x18] sm:$0xff] (!%p185_p10)  ;;  %vm341_vm3 = vcmask (!%p185_p10), 261120  }
  0x10   : > { %612 = vmatprep.mubr.msk.f32.mxu0 (!%p185_p10), %vm829_vm2, %v830_v5  ;;  %647 = vmatprep.mubr.msk.f32.mxu1 (!%p185_p10), %vm829_vm2, %v830_v5  ;;  %v655_v8 = vpack.c.bf16 (!%p185_p10), %v228_v7, %v227_v6  ;;  %vm942_vm4 = vmpackc.low (!%p185_p10), %vm341_vm3, %vm341_vm3  ;;  %v224_v15 = vld [vmem:[%s1038_s0] sm:$0x3] (!%p185_p10)  ;;  %vm322_vm5 = vcmask (!%p185_p10), 254976   ;;  %s208_s30 = sand.u32 (!%p185_p10), 1, %s810_s16   ;;  %s579_s8 = sshll.u32 (!%p185_p10), %s818_s18, 5 }
  0x11   : > { %653 = vmatpush3.bf16.xpose.msk.msra.mxu0 (!%p185_p10), %vm920_vm1, %v651_v3  ;;  %v555_v35 = vld [vmem:[%s1040_s2] ss:$0 sm:$0xff] (!%p185_p10)  ;;  %s552_s5 = sshll.u32 (!%p185_p10), %s208_s30, 1  ;;  %s993_s11 = scalar_lea.hbm (!%p185_p10), %s1042_s4, %s579_s8 }
  0x12   : > { %654 = vmatprep.subr.bf16.mxu0 (!%p185_p10), %v828_v2  ;;  %s210_s6 = scalar_lea.vmem (!%p185_p10), [#allocation3], %s552_s5  ;;  %s831_s18 = smov (!%p185_p10), [#allocation3]  }
  0x13   : > { %s752_s14 = sshll.u32 (!%p185_p10), %s831_s18, 4  ;;  %s753_s14 = int_to_ptr.vmem [resolvable:$false] %s752_s14 }
  0x16   : > { %s1057_s7 = smov (!%p213_p11, %s553_s7), 31 }
  0x17   : > { %s554_s12 = sshll.u32 %s1057_s7, 3  ;;  %s479_s7 = sshll.u32 %s210_s6, 4  ;;  %s988_s7 = int_to_ptr.vmem [resolvable:$true] %s479_s7 }
  0x18   : > { %s936_s21 = scalar_lea.vmem %s1041_s3, %s554_s12  ;;  %s465_s12 = scalar_lea.sflag [#allocation4], %s208_s30 }
  0x19   : > { %v325_v9 = vld [vmem:[%s936_s21] sm:$0xff]  ;;  %v326_v10 = vld [vmem:[%s936_s21 + $0x8] sm:$0xff]  ;;  %657 = vmatpush3.bf16.xpose.msk.msra.mxu0 %vm920_vm1, %v655_v8  ;;  %v327_v13 = vld [vmem:[%s936_s21 + $0x10] sm:$0xff]  ;;  %s748_s13 = scalar_lea.vmem %s988_s7, 32  ;;  %p755_p1 = scmp.lt.s32.totalorder %s988_s7, %s753_s14 }
  0x1a   : > { %v659_v12 = vpack.c.bf16 %v326_v10, %v325_v9  ;;  %v328_v14 = vld [vmem:[%s936_s21 + $0x18] sm:$0xff]  ;;  %v329_v17 = vld [vmem:[%s936_s21 + $0x20] sm:$0xff]  ;;  %v330_v18 = vld [vmem:[%s936_s21 + $0x28] sm:$0xff]  ;;  %p749_p12 = scmp.ne.s32.totalorder %s988_s7, %s748_s13 }
  0x1b   : > { %v663_v16 = vpack.c.bf16 %v328_v14, %v327_v13  ;;  %v667_v19 = vpack.c.bf16 %v330_v18, %v329_v17  ;;  %v331_v20 = vld [vmem:[%s936_s21 + $0x30] sm:$0xff]  ;;  %v332_v21 = vld [vmem:[%s936_s21 + $0x38] sm:$0xff]  ;;  %v333_v23 = vld [vmem:[%s936_s21 + $0x40] sm:$0xff] }
  0x1c   : > { %661 = vmatpush3.bf16.xpose.msk.msra.mxu1 %vm942_vm4, %v659_v12  ;;  %v671_v22 = vpack.c.bf16 %v332_v21, %v331_v20  ;;  %v334_v24 = vld [vmem:[%s936_s21 + $0x48] sm:$0xff]  ;;  %v335_v26 = vld [vmem:[%s936_s21 + $0x50] sm:$0xff]  ;;  %v336_v27 = vld [vmem:[%s936_s21 + $0x58] sm:$0xff]  ;;  %p750_p13 = pnand %p749_p12, %p897_p4 }
  0x1d   : > { %662 = vmatprep.subr.bf16.mxu1 %v828_v2  ;;  %v675_v25 = vpack.c.bf16 %v334_v24, %v333_v23  ;;  %v679_v28 = vpack.c.bf16 %v336_v27, %v335_v26  ;;  %v337_v29 = vld [vmem:[%s936_s21 + $0x60] sm:$0xff]  ;;  %v338_v30 = vld [vmem:[%s936_s21 + $0x68] sm:$0xff]  ;;  %v339_v32 = vld [vmem:[%s936_s21 + $0x70] sm:$0xff] }
  0x1e   : > { %v683_v31 = vpack.c.bf16 %v338_v30, %v337_v29  ;;  %v340_v33 = vld [vmem:[%s936_s21 + $0x78] sm:$0xff]  ;;  %p751_p0 = pneg %p750_p13  ;;  %s754_s21 = scalar_lea.vmem %s753_s14, 64 }
  0x1f   : > { %v687_v34 = vpack.c.bf16 %v340_v33, %v339_v32  ;;  %p756_p2 = scmp.lt.s32.totalorder %s754_s21, %s748_s13 }
  0x20   : > { %613 = vmatmul.mubr.msk.f32.vlgmr.msra.gmra.mrb[0].mxu0 %vm236_vm0, %v224_v15 }
  0x21   : > { %p757_p3 = por %p756_p2, %p755_p1 }
  0x23   : > { %p758_p5 = pnand %p757_p3, %p751_p0 }
  0x24   : > { %665 = vmatpush3.bf16.xpose.msk.msra.mxu1 %vm942_vm4, %v663_v16 }
  0x25   : > { %666 = vmatprep.subr.bf16.mxu1 %v828_v2 }
  0x2c   : > { %669 = vmatpush3.bf16.xpose.msk.msra.mxu1 %vm942_vm4, %v667_v19 }
  0x2d   : > { %670 = vmatprep.subr.bf16.mxu1 %v828_v2 }
  0x34   : > { %673 = vmatpush3.bf16.xpose.msk.msra.mxu1 %vm942_vm4, %v671_v22 }
  0x35   : > { %674 = vmatprep.subr.bf16.mxu1 %v828_v2 }
  0x3c   : > { %677 = vmatpush3.bf16.xpose.msk.msra.mxu1 %vm942_vm4, %v675_v25 }
  0x3d   : > { %678 = vmatprep.subr.bf16.mxu1 %v828_v2 }
  0x44   : > { %681 = vmatpush3.bf16.xpose.msk.msra.mxu1 %vm942_vm4, %v679_v28 }
  0x45   : > { %682 = vmatprep.subr.bf16.mxu1 %v828_v2 }
  0x4c   : > { %685 = vmatpush3.bf16.xpose.msk.msra.mxu1 %vm942_vm4, %v683_v31 }
  0x4d   : > { %686 = vmatprep.subr.bf16.mxu1 %v828_v2 }
  0x54   : > { %689 = vmatpush3.bf16.xpose.msk.msra.mxu1 %vm942_vm4, %v687_v34 }
  0xf3   : > { %v318_v36 = vpop.f32.mrb[0].mxu0 }
  0xf4   : > { %v319_v37 = vadd.f32 %v555_v35, %v318_v36  ;;  %v614_v38 = vpop.f32.mrb[1].mxu0 }
  0xf6   : > { %323 = vst.msk [vmem:[#allocation2] sm:$0x3] %vm322_vm5, %v319_v37 }
  0xfd   : > { %v324_v39 = vld [vmem:[#allocation2] sm:$0x3] }
  0xfe   : > { %648 = vmatmul.mubr.msk.f32.vlgmr.msra.gmra.mrb[0].mxu1 %vm341_vm3, %v324_v39 }
 0x1d1   : > { %v459_v40 = vpop.f32.mrb[0].mxu1 }
 0x1d2   : > { %463 = vst [vmem:[%s210_s6] sm:$0x3] %v459_v40  ;;  %v649_v41 = vpop.f32.mrb[1].mxu1 }
 0x1d3   : > { %761 = shalt.err (!%p758_p5)
}
 0x1d4   : > { %s762_s22 = scalar_lea.hbm %s993_s11, 32  ;;  %s766_s29 = scalar_lea.hbm %s1042_s4, 64 }
 0x1d5   : > { %p763_p6 = scmp.ne.s32.totalorder %s993_s11, %s762_s22  ;;  %p767_p10 = scmp.lt.u32.totalorder %s993_s11, %s1042_s4 }
 0x1d6   : > { %p768_p11 = scmp.lt.u32.totalorder %s766_s29, %s762_s22  ;;  %p770_p13 = scmp.lt.u32.totalorder %s762_s22, %s993_s11 }
 0x1d7   : > { %p764_p7 = pnand %p763_p6, %p897_p4 }
 0x1d8   : > { %p769_p12 = por %p768_p11, %p767_p10 }
 0x1d9   : > { %p765_p9 = pneg %p764_p7 }
 0x1da   : > { %p771_p0 = por %p770_p13, %p769_p12 }
 0x1dc   : > { %p772_p1 = pnand %p771_p0, %p765_p9 }
 0x1de   : > { %775 = shalt.err (!%p772_p1)
}
 0x1df   : > { %690 = dma.vmem_to_hbm [thread:$0]  (%p897_p4), %s988_s7, 32, %s993_s11, %s465_s12  }
 0x1e0 PF: > { %p696_p2 = scmp.ge.s32.totalorder %s826_s20, 2  ;;  %s491_s6 = sand.u32 1, %s806_s15  }
 0x1e1   : > { %s492_s8 = scalar_lea.sflag [#allocation4], %s491_s6 }
 0x1e2   : > { %p693_p3 = pnand %p696_p2, %p904_p8 }
 0x1e4   : > { %801 = dma.done.wait (!%p693_p3), %s492_s8, 32  }
 0x1e5   : > { %803 = vsyncadd (!%p693_p3), %s492_s8, 4294967264  ;;  %s17_s20 = sadd.s32 1, %s826_s20   ;;  %s1049_s15 = smov %s810_s16 }
 0x1e6   : > { %p14_p5 = scmp.ge.s32.totalorder %s17_s20, 4   ;;  %s1050_s16 = smov %s814_s17 }
 0x1e7   : > { %s1051_s17 = smov %s910_s28  ;;  %s1052_s18 = smov %s822_s19 }
 0x1e8   : > { %s1053_s19 = smov %s1055_s23  ;;  %16 = sbr.rel (!%p14_p5) target bundleno = 4 (0x4), region = 75 }
 0x1ef   :  { %497 = vsyncpa [#allocation4], 1 }
 0x1f0   :  { %499 = vsyncpa [#allocation4 + $0x1], 1 }

</bundles_post_ra>
